<compile_context>
chip_gen: v5e
topology: v5e:2x2
jax: 0.10.0
libtpu: 0.0.40
codegen_flags: <defaults>
</compile_context>

<pallas_src>
import math

import jax
import jax.numpy as jnp
from jax import lax
from jax.experimental import pallas as pl
from jax.experimental.pallas import tpu as pltpu


def _round_up(x, m):
    return ((x + m - 1) // m) * m


# -----------------------------------------------------------------------------
# Slab layout (slab = round_up(max(L+CD+H, CD+TE, L+C+1), 128) lanes)
#
#   W[0]: cond-L1        rows [0:C)          -> cols [0:CD)
#   W[1]: cond-L2        rows [0:CD)         -> cols [L:L+CD)       (c_feat lanes)
#         time-L1        rows [CD:CD+TE)     -> cols [L+CD:L+CD+H)
#   W[2]: time-L2        rows [L+CD:L+CD+H)  -> cols [L+CD:L+CD+H)  (t_feat lanes)
#   W[3]: main-L1        rows [0:L+CD+H)     -> cols [0:H)
#   W[4]: main-L2        rows [0:H)          -> cols [0:H)
#   W[5]: main-L3        rows [0:H)          -> cols [0:L)          (output lanes)
#
#   Bb[0]: bc1 at [0:CD), pi/2 at [CD+half:CD+TE)        (cos == sin(x + pi/2))
#   Bb[1]: bc2 at [L:L+CD), bt1 at [L+CD:L+CD+H)
#   Bb[2]: bt2 at [L+CD:L+CD+H)
#   Bb[3]: b1 at [0:H);  Bb[4]: b2 at [0:H);  Bb[5]: b3 at [0:L)
#   Bb[6]: sinusoidal freqs at [CD:CD+half) and [CD+half:CD+TE)  (rank-1 row)
#
# All unused rows/cols/lanes are zero, so padded lanes never contribute.
# -----------------------------------------------------------------------------


def _make_kernel(latent_dim, n_cond, cond_dim, hidden_dim, slab, compute_dtype):
    f32 = jnp.float32
    L, C, CD, H = latent_dim, n_cond, cond_dim, hidden_dim
    inv_sqrt2 = 1.0 / math.sqrt(2.0)

    def mm(x, w_tile):
        # bf16 operands -> single MXU pass; f32 operands -> Mosaic's
        # high-precision multi-pass f32 matmul.  Accumulation is always f32.
        return jnp.dot(x.astype(compute_dtype), w_tile, preferred_element_type=f32)

    def kernel(z_ref, c_ref, t_ref, w_ref, b_ref, o_ref, xs_ref):
        tb = z_ref.shape[0]
        # Hoisted (1, slab) lane index; broadcasting handles the (TB, slab) masks.
        lane = lax.broadcasted_iota(jnp.int32, (1, slab), 1)

        # ---- lane-place cond into the activation slab (offset-0 masked store;
        #      the zero-fill guarantees padded lanes only ever hit zero weight rows).
        xs_ref[...] = jnp.zeros((tb, slab), f32)
        xs_ref[:, 0:C] = c_ref[...]

        # ---- fused layer 0:
        #        cond-L1 via MXU (output cols [0:CD));
        #        sinusoidal time embedding via a free VPU rank-1 multiply
        #        (t * freq_row), with a +pi/2 bias realizing the cos half.
        y0 = mm(xs_ref[...], w_ref[0]) + t_ref[...] * b_ref[6:7, :] + b_ref[0:1, :]
        a0 = jnp.where(lane < CD, jnp.maximum(y0, 0.0), jnp.sin(y0))

        # ---- fused layer 1: cond-L2 -> c_feat lanes, time-L1 -> time-hidden lanes.
        y1 = mm(a0, w_ref[1]) + b_ref[1:2, :]
        g1 = 0.5 * y1 * (1.0 + lax.erf(y1 * inv_sqrt2))       # exact GELU (time branch)
        a1 = jnp.where(lane < L + CD, y1, g1)                 # c_feat passthrough | GELU

        # ---- time-L2 -> t_feat lives at lanes [L+CD:L+CD+H)
        t_feat = mm(a1, w_ref[2]) + b_ref[2:3, :]

        # ---- concat([z, c_feat, t_feat]) realized by lane placement / masking.
        xs_ref[:, 0:L] = z_ref[...]                            # z at lanes [0:L)
        pt = jnp.where(lane < L, xs_ref[...], a1)              # z | c_feat | (junk)
        pt = jnp.where(lane < L + CD, pt, 0.0)                 # zero the t_feat lanes
        x_main = pt + t_feat

        # ---- main MLP
        x1 = jnp.maximum(mm(x_main, w_ref[3]) + b_ref[3:4, :], 0.0)
        x2 = jnp.maximum(mm(x1, w_ref[4]) + b_ref[4:5, :], 0.0)
        # Lane-dense output slab; valid velocity lives in lanes [0:L).
        o_ref[...] = mm(x2, w_ref[5]) + b_ref[5:6, :]

    return kernel


# -----------------------------------------------------------------------------
# Parameter init (PyTorch nn.Linear-style), slab packing, wrapper, reference
# -----------------------------------------------------------------------------
def init_flownn_params(key, latent_dim, n_cond, cond_dim, hidden_dim, time_emb_dim):
    def lin(k, fan_in, fan_out):
        kw, kb = jax.random.split(k)
        bound = 1.0 / math.sqrt(fan_in)
        w = jax.random.uniform(kw, (fan_in, fan_out), jnp.float32, -bound, bound)
        b = jax.random.uniform(kb, (fan_out,), jnp.float32, -bound, bound)
        return w, b

    in_dim = latent_dim + cond_dim + hidden_dim
    keys = jax.random.split(key, 7)
    wc1, bc1 = lin(keys[0], n_cond, cond_dim)
    wc2, bc2 = lin(keys[1], cond_dim, cond_dim)
    wt1, bt1 = lin(keys[2], time_emb_dim, hidden_dim)
    wt2, bt2 = lin(keys[3], hidden_dim, hidden_dim)
    w1, b1 = lin(keys[4], in_dim, hidden_dim)
    w2, b2 = lin(keys[5], hidden_dim, hidden_dim)
    w3, b3 = lin(keys[6], hidden_dim, latent_dim)
    params = dict(wc1=wc1, bc1=bc1, wc2=wc2, bc2=bc2, wt1=wt1, bt1=bt1,
                  wt2=wt2, bt2=bt2, w1=w1, b1=b1, w2=w2, b2=b2, w3=w3, b3=b3)

    half = time_emb_dim // 2
    emb_scale = math.log(10000.0) / max(half - 1, 1)   # guard time_emb_dim == 2
    freqs = jnp.exp(jnp.arange(half, dtype=jnp.float32) * -emb_scale)
    return params, freqs


def pack_flownn_slabs(params, freqs, latent_dim, n_cond, cond_dim, hidden_dim,
                      time_emb_dim, *, compute_dtype=jnp.float32):
    """Pack all weights/biases into one weight slab + one bias slab (done once)."""
    L, C, CD, H, TE = latent_dim, n_cond, cond_dim, hidden_dim, time_emb_dim
    half = TE // 2
    in_dim = L + CD + H
    slab = _round_up(max(in_dim, CD + TE, L + C + 1), 128)

    W = jnp.zeros((6, slab, slab), jnp.float32)
    Bb = jnp.zeros((7, slab), jnp.float32)

    # fused layer 0: cond-L1 (MXU); sinusoidal freqs + pi/2 cos-offset (VPU rank-1)
    W = W.at[0, 0:C, 0:CD].set(params["wc1"])
    Bb = Bb.at[0, 0:CD].set(params["bc1"])
    Bb = Bb.at[0, CD + half:CD + TE].set(math.pi / 2.0)
    Bb = Bb.at[6, CD:CD + half].set(freqs)
    Bb = Bb.at[6, CD + half:CD + TE].set(freqs)

    # fused layer 1: cond-L2 + time-L1 (disjoint output columns)
    W = W.at[1, 0:CD, L:L + CD].set(params["wc2"])
    Bb = Bb.at[1, L:L + CD].set(params["bc2"])
    W = W.at[1, CD:CD + TE, L + CD:L + CD + H].set(params["wt1"])
    Bb = Bb.at[1, L + CD:L + CD + H].set(params["bt1"])

    # time-L2
    W = W.at[2, L + CD:L + CD + H, L + CD:L + CD + H].set(params["wt2"])
    Bb = Bb.at[2, L + CD:L + CD + H].set(params["bt2"])

    # main mlp
    W = W.at[3, 0:in_dim, 0:H].set(params["w1"]); Bb = Bb.at[3, 0:H].set(params["b1"])
    W = W.at[4, 0:H, 0:H].set(params["w2"]);      Bb = Bb.at[4, 0:H].set(params["b2"])
    W = W.at[5, 0:H, 0:L].set(params["w3"]);      Bb = Bb.at[5, 0:L].set(params["b3"])
    # Weight slab dtype selects the MXU path (bf16 single-pass vs f32 multi-pass).
    return W.astype(compute_dtype), Bb


def _pick_batch_tile(B):
    if B <= 128:
        return _round_up(B, 8)             # tiny batch: single block
    if B <= 2048:
        return _round_up((B + 1) // 2, 8)  # two blocks -> both v7x TensorCores busy
    return 1024                            # large batch: stream 1024-row blocks


def flownn_forward(z, t, cond, w_slab, b_slab, *, cond_dim, hidden_dim):
    B, L = z.shape
    C = cond.shape[1]
    slab = w_slab.shape[-1]
    compute_dtype = w_slab.dtype            # bf16 slab -> single-pass MXU; f32 -> exact

    TB = _pick_batch_tile(B)
    grid = pl.cdiv(B, TB)                   # ragged last block handled by Pallas

    z32 = z.astype(jnp.float32)
    c32 = cond.astype(jnp.float32)
    t32 = t.reshape(B, 1).astype(jnp.float32)

    kernel = _make_kernel(L, C, cond_dim, hidden_dim, slab, compute_dtype)
    out = pl.pallas_call(
        kernel,
        out_shape=jax.ShapeDtypeStruct((B, slab), jnp.float32),
        grid=(grid,),
        in_specs=[
            pl.BlockSpec((TB, L), lambda i: (i, 0)),             # z     (streams)
            pl.BlockSpec((TB, C), lambda i: (i, 0)),             # cond  (streams)
            pl.BlockSpec((TB, 1), lambda i: (i, 0)),             # t     (streams)
            pl.BlockSpec((6, slab, slab), lambda i: (0, 0, 0)),  # weights (resident)
            pl.BlockSpec((7, slab), lambda i: (0, 0)),           # biases  (resident)
        ],
        out_specs=pl.BlockSpec((TB, slab), lambda i: (i, 0)),
        scratch_shapes=[pltpu.VMEM((TB, slab), jnp.float32)],    # activation slab
        compiler_params=pltpu.CompilerParams(
            dimension_semantics=("parallel",)),                  # v7x: 2 TCs split grid
    )(z32, c32, t32, w_slab, b_slab)
    # TODO(synk): for ODE sampling loops, add a trailing step axis (or an in-kernel
    # Euler loop with input_output_aliases on z) so weights stay resident across all
    # integration steps, and let downstream consumers read the lane-dense slab
    # directly to avoid this slice-copy.
    return out[:, :L]


# -----------------------------------------------------------------------------
# Pure-JAX reference (mirrors the PyTorch forward) for verification
# -----------------------------------------------------------------------------
def flownn_reference(z, t, cond, params, freqs):
    h = jnp.maximum(cond @ params["wc1"] + params["bc1"], 0.0)
    c_feat = h @ params["wc2"] + params["bc2"]

    emb = t[:, None] * freqs[None, :]
    t_embed = jnp.concatenate([jnp.sin(emb), jnp.cos(emb)], axis=-1)
    ht = t_embed @ params["wt1"] + params["bt1"]
    ht = 0.5 * ht * (1.0 + lax.erf(ht / math.sqrt(2.0)))        # exact GELU
    t_feat = ht @ params["wt2"] + params["bt2"]

    x = jnp.concatenate([z, c_feat, t_feat], axis=1)
    x1 = jnp.maximum(x @ params["w1"] + params["b1"], 0.0)
    x2 = jnp.maximum(x1 @ params["w2"] + params["b2"], 0.0)
    return x2 @ params["w3"] + params["b3"]


if __name__ == "__main__":
    def run_case(key, B, latent_dim, n_cond, cond_dim, hidden_dim, time_emb_dim,
                 compute_dtype, atol, rtol):
        kp, kz, kt, kc = jax.random.split(key, 4)
        params, freqs = init_flownn_params(
            kp, latent_dim, n_cond, cond_dim, hidden_dim, time_emb_dim)
        # Slabs are packed ONCE (amortized across all forward / sampling calls).
        w_slab, b_slab = pack_flownn_slabs(
            params, freqs, latent_dim, n_cond, cond_dim, hidden_dim, time_emb_dim,
            compute_dtype=compute_dtype)

        z = jax.random.normal(kz, (B, latent_dim), jnp.float32)
        t = jax.random.uniform(kt, (B,), jnp.float32)            # in [0, 1]
        cond = jax.random.normal(kc, (B, n_cond), jnp.float32)

        out = flownn_forward(z, t, cond, w_slab, b_slab,
                             cond_dim=cond_dim, hidden_dim=hidden_dim)
        out = jax.block_until_ready(out)

        with jax.default_matmul_precision("highest"):
            ref = flownn_reference(z, t, cond, params, freqs)
        assert out.shape == (B, latent_dim)
        err = float(jnp.max(jnp.abs(out - ref)))
        assert jnp.allclose(out, ref, atol=atol, rtol=rtol), \
            f"mismatch (B={B}, dtype={compute_dtype}): max err {err}"

    key = jax.random.PRNGKey(0)
    k1, k2, k3, k4 = jax.random.split(key, 4)

    # 1) tiny batch, exact f32 MXU path, small dims (single grid block)
    run_case(k1, B=8, latent_dim=16, n_cond=8, cond_dim=32, hidden_dim=32,
             time_emb_dim=16, compute_dtype=jnp.float32, atol=1e-4, rtol=1e-4)
    # 2) moderate batch: two-block grid + ragged last block (streams; 2 TCs on v7x)
    run_case(k2, B=300, latent_dim=16, n_cond=8, cond_dim=32, hidden_dim=32,
             time_emb_dim=16, compute_dtype=jnp.float32, atol=1e-4, rtol=1e-4)
    # 3) module-default-ish sizes -> slab = 256 lanes
    run_case(k3, B=16, latent_dim=16, n_cond=10, cond_dim=64, hidden_dim=128,
             time_emb_dim=64, compute_dtype=jnp.float32, atol=2e-3, rtol=2e-3)
    # 4) bf16 MXU operands (single-pass MXU, f32 accumulate) -- looser tolerance
    run_case(k4, B=64, latent_dim=16, n_cond=8, cond_dim=32, hidden_dim=32,
             time_emb_dim=16, compute_dtype=jnp.bfloat16, atol=1e-1, rtol=1e-1)

    print("KERNEL_OK")
</pallas_src>

<mosaic_0001>
module attributes {stable_mosaic.version = 11 : i64} {
  func.func @kernel(%arg0: i32, %arg1: memref<8x16xf32, #tpu.memory_space<vmem>>, %arg2: memref<8x8xf32, #tpu.memory_space<vmem>>, %arg3: memref<8x1xf32, #tpu.memory_space<vmem>>, %arg4: memref<6x128x128xf32, #tpu.memory_space<vmem>>, %arg5: memref<7x128xf32, #tpu.memory_space<vmem>>, %arg6: memref<8x128xf32, #tpu.memory_space<vmem>>, %arg7: memref<8x128xf32, #tpu.memory_space<vmem>>) attributes {dimension_semantics = [#tpu.dimension_semantics<parallel>], iteration_bounds = array<i64: 1>, scalar_prefetch = 0 : i64, scratch_operands = 1 : i64, tpu.core_type = #tpu.core_type<tc>, window_params = [{transform_indices = @transform_0, window_bounds = array<i64: 8, 16>}, {transform_indices = @transform_1, window_bounds = array<i64: 8, 8>}, {transform_indices = @transform_2, window_bounds = array<i64: 8, 1>}, {pipeline_mode = #tpu.pipeline_mode<synchronous>, transform_indices = @transform_3, window_bounds = array<i64: 6, 128, 128>}, {pipeline_mode = #tpu.pipeline_mode<synchronous>, transform_indices = @transform_4, window_bounds = array<i64: 7, 128>}, {transform_indices = @transform_5, window_bounds = array<i64: 8, 128>}]} {
    %0 = tpu.iota {dimensions = array<i32: 1>} : vector<1x128xi32>
    %cst = arith.constant 0.000000e+00 : f32
    %1 = vector.broadcast %cst : f32 to vector<8x128xf32>
    %c0 = arith.constant 0 : index
    %c0_0 = arith.constant 0 : index
    %2 = vector.load %arg7[%c0, %c0_0] : memref<8x128xf32, #tpu.memory_space<vmem>>, vector<8x128xf32>
    tpu.vector_store %arg7[%c0, %c0_0], %1 {strides = array<i32>} : memref<8x128xf32, #tpu.memory_space<vmem>>, vector<8x128xf32>,
    %c0_1 = arith.constant 0 : index
    %c0_2 = arith.constant 0 : index
    %3 = vector.load %arg2[%c0_1, %c0_2] : memref<8x8xf32, #tpu.memory_space<vmem>>, vector<8x8xf32>
    %c0_3 = arith.constant 0 : index
    %c0_4 = arith.constant 0 : index
    %4 = vector.load %arg7[%c0_3, %c0_4] : memref<8x128xf32, #tpu.memory_space<vmem>>, vector<8x8xf32>
    tpu.vector_store %arg7[%c0_3, %c0_4], %3 {strides = array<i32>} : memref<8x128xf32, #tpu.memory_space<vmem>>, vector<8x8xf32>,
    %c0_5 = arith.constant 0 : index
    %c0_6 = arith.constant 0 : index
    %5 = vector.load %arg7[%c0_5, %c0_6] : memref<8x128xf32, #tpu.memory_space<vmem>>, vector<8x128xf32>
    %c0_7 = arith.constant 0 : index
    %c0_8 = arith.constant 0 : index
    %c0_9 = arith.constant 0 : index
    %6 = vector.load %arg4[%c0_7, %c0_8, %c0_9] : memref<6x128x128xf32, #tpu.memory_space<vmem>>, vector<1x128x128xf32>
    %7 = vector.shape_cast %6 : vector<1x128x128xf32> to vector<128x128xf32>
    %cst_10 = arith.constant dense<0.000000e+00> : vector<8x128xf32>
    %8 = tpu.matmul %5, %7, %cst_10 {dimension_numbers = #tpu.dot_dimension_numbers<[1], [0], [0], [1], [0, 0, 1, 1], [], []>} : vector<8x128xf32>, vector<128x128xf32>, vector<8x128xf32> -> vector<8x128xf32>
    %c0_11 = arith.constant 0 : index
    %c0_12 = arith.constant 0 : index
    %9 = vector.load %arg3[%c0_11, %c0_12] : memref<8x1xf32, #tpu.memory_space<vmem>>, vector<8x1xf32>
    %c6 = arith.constant 6 : index
    %c0_13 = arith.constant 0 : index
    %10 = vector.load %arg5[%c6, %c0_13] : memref<7x128xf32, #tpu.memory_space<vmem>>, vector<1x128xf32>
    %11 = vector.broadcast %9 : vector<8x1xf32> to vector<8x128xf32>
    %12 = vector.broadcast %10 : vector<1x128xf32> to vector<8x128xf32>
    %13 = arith.mulf %11, %12 : vector<8x128xf32>
    %14 = arith.addf %8, %13 : vector<8x128xf32>
    %c0_14 = arith.constant 0 : index
    %c0_15 = arith.constant 0 : index
    %15 = vector.load %arg5[%c0_14, %c0_15] : memref<7x128xf32, #tpu.memory_space<vmem>>, vector<1x128xf32>
    %16 = vector.broadcast %15 : vector<1x128xf32> to vector<8x128xf32>
    %17 = arith.addf %14, %16 : vector<8x128xf32>
    %c32_i32 = arith.constant 32 : i32
    %18 = vector.broadcast %c32_i32 : i32 to vector<1x128xi32>
    %19 = arith.cmpi slt, %0, %18 : vector<1x128xi32>
    %cst_16 = arith.constant 0.000000e+00 : f32
    %20 = vector.broadcast %cst_16 : f32 to vector<8x128xf32>
    %21 = arith.maximumf %17, %20 : vector<8x128xf32>
    %22 = math.sin %17 : vector<8x128xf32>
    %23 = vector.shape_cast %19 : vector<1x128xi1> to vector<1x128xi1>
    %24 = vector.broadcast %23 : vector<1x128xi1> to vector<8x128xi1>
    %25 = arith.select %24, %21, %22 : vector<8x128xi1>, vector<8x128xf32>
    %c1 = arith.constant 1 : index
    %c0_17 = arith.constant 0 : index
    %c0_18 = arith.constant 0 : index
    %26 = vector.load %arg4[%c1, %c0_17, %c0_18] : memref<6x128x128xf32, #tpu.memory_space<vmem>>, vector<1x128x128xf32>
    %27 = vector.shape_cast %26 : vector<1x128x128xf32> to vector<128x128xf32>
    %cst_19 = arith.constant dense<0.000000e+00> : vector<8x128xf32>
    %28 = tpu.matmul %25, %27, %cst_19 {dimension_numbers = #tpu.dot_dimension_numbers<[1], [0], [0], [1], [0, 0, 1, 1], [], []>} : vector<8x128xf32>, vector<128x128xf32>, vector<8x128xf32> -> vector<8x128xf32>
    %c1_20 = arith.constant 1 : index
    %c0_21 = arith.constant 0 : index
    %29 = vector.load %arg5[%c1_20, %c0_21] : memref<7x128xf32, #tpu.memory_space<vmem>>, vector<1x128xf32>
    %30 = vector.broadcast %29 : vector<1x128xf32> to vector<8x128xf32>
    %31 = arith.addf %28, %30 : vector<8x128xf32>
    %cst_22 = arith.constant 5.000000e-01 : f32
    %32 = vector.broadcast %cst_22 : f32 to vector<8x128xf32>
    %33 = arith.mulf %32, %31 : vector<8x128xf32>
    %cst_23 = arith.constant 0.707106769 : f32
    %34 = vector.broadcast %cst_23 : f32 to vector<8x128xf32>
    %35 = arith.mulf %31, %34 : vector<8x128xf32>
    %36 = math.erf %35 : vector<8x128xf32>
    %cst_24 = arith.constant 1.000000e+00 : f32
    %37 = vector.broadcast %cst_24 : f32 to vector<8x128xf32>
    %38 = arith.addf %37, %36 : vector<8x128xf32>
    %39 = arith.mulf %33, %38 : vector<8x128xf32>
    %c48_i32 = arith.constant 48 : i32
    %40 = vector.broadcast %c48_i32 : i32 to vector<1x128xi32>
    %41 = arith.cmpi slt, %0, %40 : vector<1x128xi32>
    %42 = vector.shape_cast %41 : vector<1x128xi1> to vector<1x128xi1>
    %43 = vector.broadcast %42 : vector<1x128xi1> to vector<8x128xi1>
    %44 = arith.select %43, %31, %39 : vector<8x128xi1>, vector<8x128xf32>
    %c2 = arith.constant 2 : index
    %c0_25 = arith.constant 0 : index
    %c0_26 = arith.constant 0 : index
    %45 = vector.load %arg4[%c2, %c0_25, %c0_26] : memref<6x128x128xf32, #tpu.memory_space<vmem>>, vector<1x128x128xf32>
    %46 = vector.shape_cast %45 : vector<1x128x128xf32> to vector<128x128xf32>
    %cst_27 = arith.constant dense<0.000000e+00> : vector<8x128xf32>
    %47 = tpu.matmul %44, %46, %cst_27 {dimension_numbers = #tpu.dot_dimension_numbers<[1], [0], [0], [1], [0, 0, 1, 1], [], []>} : vector<8x128xf32>, vector<128x128xf32>, vector<8x128xf32> -> vector<8x128xf32>
    %c2_28 = arith.constant 2 : index
    %c0_29 = arith.constant 0 : index
    %48 = vector.load %arg5[%c2_28, %c0_29] : memref<7x128xf32, #tpu.memory_space<vmem>>, vector<1x128xf32>
    %49 = vector.broadcast %48 : vector<1x128xf32> to vector<8x128xf32>
    %50 = arith.addf %47, %49 : vector<8x128xf32>
    %c0_30 = arith.constant 0 : index
    %c0_31 = arith.constant 0 : index
    %51 = vector.load %arg1[%c0_30, %c0_31] : memref<8x16xf32, #tpu.memory_space<vmem>>, vector<8x16xf32>
    %c0_32 = arith.constant 0 : index
    %c0_33 = arith.constant 0 : index
    %52 = vector.load %arg7[%c0_32, %c0_33] : memref<8x128xf32, #tpu.memory_space<vmem>>, vector<8x16xf32>
    tpu.vector_store %arg7[%c0_32, %c0_33], %51 {strides = array<i32>} : memref<8x128xf32, #tpu.memory_space<vmem>>, vector<8x16xf32>,
    %c16_i32 = arith.constant 16 : i32
    %53 = vector.broadcast %c16_i32 : i32 to vector<1x128xi32>
    %54 = arith.cmpi slt, %0, %53 : vector<1x128xi32>
    %c0_34 = arith.constant 0 : index
    %c0_35 = arith.constant 0 : index
    %55 = vector.load %arg7[%c0_34, %c0_35] : memref<8x128xf32, #tpu.memory_space<vmem>>, vector<8x128xf32>
    %56 = vector.shape_cast %54 : vector<1x128xi1> to vector<1x128xi1>
    %57 = vector.broadcast %56 : vector<1x128xi1> to vector<8x128xi1>
    %58 = arith.select %57, %55, %44 : vector<8x128xi1>, vector<8x128xf32>
    %c48_i32_36 = arith.constant 48 : i32
    %59 = vector.broadcast %c48_i32_36 : i32 to vector<1x128xi32>
    %60 = arith.cmpi slt, %0, %59 : vector<1x128xi32>
    %cst_37 = arith.constant 0.000000e+00 : f32
    %61 = vector.shape_cast %60 : vector<1x128xi1> to vector<1x128xi1>
    %62 = vector.broadcast %61 : vector<1x128xi1> to vector<8x128xi1>
    %63 = vector.broadcast %cst_37 : f32 to vector<8x128xf32>
    %64 = arith.select %62, %58, %63 : vector<8x128xi1>, vector<8x128xf32>
    %65 = arith.addf %64, %50 : vector<8x128xf32>
    %c3 = arith.constant 3 : index
    %c0_38 = arith.constant 0 : index
    %c0_39 = arith.constant 0 : index
    %66 = vector.load %arg4[%c3, %c0_38, %c0_39] : memref<6x128x128xf32, #tpu.memory_space<vmem>>, vector<1x128x128xf32>
    %67 = vector.shape_cast %66 : vector<1x128x128xf32> to vector<128x128xf32>
    %cst_40 = arith.constant dense<0.000000e+00> : vector<8x128xf32>
    %68 = tpu.matmul %65, %67, %cst_40 {dimension_numbers = #tpu.dot_dimension_numbers<[1], [0], [0], [1], [0, 0, 1, 1], [], []>} : vector<8x128xf32>, vector<128x128xf32>, vector<8x128xf32> -> vector<8x128xf32>
    %c3_41 = arith.constant 3 : index
    %c0_42 = arith.constant 0 : index
    %69 = vector.load %arg5[%c3_41, %c0_42] : memref<7x128xf32, #tpu.memory_space<vmem>>, vector<1x128xf32>
    %70 = vector.broadcast %69 : vector<1x128xf32> to vector<8x128xf32>
    %71 = arith.addf %68, %70 : vector<8x128xf32>
    %cst_43 = arith.constant 0.000000e+00 : f32
    %72 = vector.broadcast %cst_43 : f32 to vector<8x128xf32>
    %73 = arith.maximumf %71, %72 : vector<8x128xf32>
    %c4 = arith.constant 4 : index
    %c0_44 = arith.constant 0 : index
    %c0_45 = arith.constant 0 : index
    %74 = vector.load %arg4[%c4, %c0_44, %c0_45] : memref<6x128x128xf32, #tpu.memory_space<vmem>>, vector<1x128x128xf32>
    %75 = vector.shape_cast %74 : vector<1x128x128xf32> to vector<128x128xf32>
    %cst_46 = arith.constant dense<0.000000e+00> : vector<8x128xf32>
    %76 = tpu.matmul %73, %75, %cst_46 {dimension_numbers = #tpu.dot_dimension_numbers<[1], [0], [0], [1], [0, 0, 1, 1], [], []>} : vector<8x128xf32>, vector<128x128xf32>, vector<8x128xf32> -> vector<8x128xf32>
    %c4_47 = arith.constant 4 : index
    %c0_48 = arith.constant 0 : index
    %77 = vector.load %arg5[%c4_47, %c0_48] : memref<7x128xf32, #tpu.memory_space<vmem>>, vector<1x128xf32>
    %78 = vector.broadcast %77 : vector<1x128xf32> to vector<8x128xf32>
    %79 = arith.addf %76, %78 : vector<8x128xf32>
    %cst_49 = arith.constant 0.000000e+00 : f32
    %80 = vector.broadcast %cst_49 : f32 to vector<8x128xf32>
    %81 = arith.maximumf %79, %80 : vector<8x128xf32>
    %c5 = arith.constant 5 : index
    %c0_50 = arith.constant 0 : index
    %c0_51 = arith.constant 0 : index
    %82 = vector.load %arg4[%c5, %c0_50, %c0_51] : memref<6x128x128xf32, #tpu.memory_space<vmem>>, vector<1x128x128xf32>
    %83 = vector.shape_cast %82 : vector<1x128x128xf32> to vector<128x128xf32>
    %cst_52 = arith.constant dense<0.000000e+00> : vector<8x128xf32>
    %84 = tpu.matmul %81, %83, %cst_52 {dimension_numbers = #tpu.dot_dimension_numbers<[1], [0], [0], [1], [0, 0, 1, 1], [], []>} : vector<8x128xf32>, vector<128x128xf32>, vector<8x128xf32> -> vector<8x128xf32>
    %c5_53 = arith.constant 5 : index
    %c0_54 = arith.constant 0 : index
    %85 = vector.load %arg5[%c5_53, %c0_54] : memref<7x128xf32, #tpu.memory_space<vmem>>, vector<1x128xf32>
    %86 = vector.broadcast %85 : vector<1x128xf32> to vector<8x128xf32>
    %87 = arith.addf %84, %86 : vector<8x128xf32>
    %c0_55 = arith.constant 0 : index
    %c0_56 = arith.constant 0 : index
    %88 = vector.load %arg6[%c0_55, %c0_56] : memref<8x128xf32, #tpu.memory_space<vmem>>, vector<8x128xf32>
    tpu.vector_store %arg6[%c0_55, %c0_56], %87 {strides = array<i32>} : memref<8x128xf32, #tpu.memory_space<vmem>>, vector<8x128xf32>,
    return
  }
  func.func @transform_0(%arg0: i32) -> (i32, i32) {
    %c0_i32 = arith.constant 0 : i32
    %c0_i32_0 = arith.constant 0 : i32
    return %arg0, %c0_i32 : i32, i32
  }
  func.func @transform_1(%arg0: i32) -> (i32, i32) {
    %c0_i32 = arith.constant 0 : i32
    %c0_i32_0 = arith.constant 0 : i32
    return %arg0, %c0_i32 : i32, i32
  }
  func.func @transform_2(%arg0: i32) -> (i32, i32) {
    %c0_i32 = arith.constant 0 : i32
    %c0_i32_0 = arith.constant 0 : i32
    return %arg0, %c0_i32 : i32, i32
  }
  func.func @transform_3(%arg0: i32) -> (i32, i32, i32) {
    %c0_i32 = arith.constant 0 : i32
    %c0_i32_0 = arith.constant 0 : i32
    %c0_i32_1 = arith.constant 0 : i32
    %c0_i32_2 = arith.constant 0 : i32
    return %c0_i32, %c0_i32_0, %c0_i32_1 : i32, i32, i32
  }
  func.func @transform_4(%arg0: i32) -> (i32, i32) {
    %c0_i32 = arith.constant 0 : i32
    %c0_i32_0 = arith.constant 0 : i32
    %c0_i32_1 = arith.constant 0 : i32
    return %c0_i32, %c0_i32_0 : i32, i32
  }
  func.func @transform_5(%arg0: i32) -> (i32, i32) {
    %c0_i32 = arith.constant 0 : i32
    %c0_i32_0 = arith.constant 0 : i32
    return %arg0, %c0_i32 : i32, i32
  }
}

</mosaic_0001>

<bundles_post_ra>
// kernel: tpu_custom_call.1
= control target key start
LH: loop header
LB: loop body
LE: loop exit
PB: predicated region body
PF: predicated region fallthrough
CT: control target
= control target key end

     0   :  { %10 = vsyncpa [#allocation4], 0  ;;  %s822_s0 = inlined_call_operand.vmem [shape: f32[8,16], index: 0, kind: input, shape index: {}]   ;;  %s823_s1 = inlined_call_operand.hbm [shape: f32[8,8], index: 1, kind: input, shape index: {}]   ;;  %s824_s2 = inlined_call_operand.vmem [shape: f32[8,1], index: 2, kind: input, shape index: {}]   ;;  %s825_s3 = inlined_call_operand.hbm [shape: f32[6,128,128], index: 3, kind: input, shape index: {}]   ;;  %s826_s4 = inlined_call_operand.hbm [shape: f32[7,128], index: 4, kind: input, shape index: {}]   ;;  %s827_s5 = inlined_call_operand.hbm [shape: f32[8,128], index: 5, kind: output, shape index: {}]  }
   0x1   :  { %11 = vsyncpa [#allocation7], 0  ;;  %s32_s20 = sshll.u32 %s825_s3, 4  ;;  %s33_s20 = int_to_ptr.hbm [resolvable:$true] %s32_s20 }
   0x2   :  { %12 = vsyncpa [#allocation5], 0  ;;  %s683_s21 = smov [#allocation6]   ;;  %s20_s25 = sshll.u32 %s823_s1, 4  ;;  %s21_s25 = int_to_ptr.hbm [resolvable:$true] %s20_s25 }
   0x3   :  { %s34_s22 = sshll.u32 %s683_s21, 4  ;;  %s684_s26 = smov 128   ;;  %s35_s22 = int_to_ptr.vmem [resolvable:$true] %s34_s22 }
   0x4   :  { %s685_s27 = smov 8   ;;  %s686_s28 = smov [#allocation3]  }
   0x5   :  { %40 = dma.hbm_to_vmem [thread:$0]  %s33_s20, 12288, %s35_s22, [#allocation7], %s684_s26, %s684_s26, %s685_s27  }
   0x6   :  { %s22_s29 = sshll.u32 %s686_s28, 4  ;;  %s46_s7 = sshll.u32 %s826_s4, 4  ;;  %s23_s29 = int_to_ptr.vmem [resolvable:$true] %s22_s29  ;;  %s47_s7 = int_to_ptr.hbm [resolvable:$true] %s46_s7 }
   0x7   :  { %25 = dma.hbm_to_vmem [thread:$0]  %s21_s25, 128, %s23_s29, [#allocation4]  }
   0x8   :  { %s687_s3 = smov [#allocation8]  }
   0x9   :  { %s48_s8 = sshll.u32 %s687_s3, 4  ;;  %s49_s8 = int_to_ptr.vmem [resolvable:$true] %s48_s8 }
   0xa   :  { %51 = dma.hbm_to_vmem [thread:$0]  %s47_s7, 128, %s49_s8, [#allocation7]  }
   0xb   :  { %677 = dma.done.wait [#allocation4], 128  }
   0xc   :  { %678 = vsyncadd [#allocation4], 4294967168 }
   0xd   :  { %679 = dma.done.wait [#allocation7], 12416  }
   0xe   :  { %680 = vsyncadd [#allocation7], 4294954880  ;;  %v688_v0 = vmov 0.0   ;;  %v86_v1 = vld [vmem:[#allocation6 + $0x78] sm:$0xff]  ;;  %v85_v2 = vld [vmem:[#allocation6 + $0x70] sm:$0xff]  ;;  %v689_v3 = vmov 0  }
   0xf   :  { %66 = vst [vmem:[#allocation2] sm:$0xff] %v688_v0  ;;  %96 = vmatpush.msra.mxu0 %v86_v1  ;;  %571 = vset.pattern.permute.xlu0 %v689_v3  ;;  %v84_v4 = vld [vmem:[#allocation6 + $0x68] sm:$0xff]  ;;  %vm68_vm0 = vcmask 64512   ;;  %v83_v5 = vld [vmem:[#allocation6 + $0x60] sm:$0xff]  ;;  %v82_v6 = vld [vmem:[#allocation6 + $0x58] sm:$0xff]  ;;  %vm406_vm1 = vcmask 130048  }
  0x10   :  { %v67_v7 = vld [vmem:[#allocation3] sm:$0xff]  ;;  %v81_v8 = vld [vmem:[#allocation6 + $0x50] sm:$0xff]  ;;  %v80_v10 = vld [vmem:[#allocation6 + $0x48] sm:$0xff]  ;;  %v690_v56 = vmov 683565275   ;;  %s542_s13 = sshll.u32 %s827_s5, 4  ;;  %s543_s13 = int_to_ptr.hbm [resolvable:$true] %s542_s13 }
  0x11   :  { %97 = vmatpush.msra.mxu0 %v85_v2  ;;  %69 = vst.msk [vmem:[#allocation2] sm:$0xff] %vm68_vm0, %v67_v7  ;;  %v87_v9 = vld [vmem:[%s824_s2] sm:$0xff]  ;;  %v79_v12 = vld [vmem:[#allocation6 + $0x40] sm:$0xff]  ;;  %v78_v14 = vld [vmem:[#allocation6 + $0x38] sm:$0xff]  ;;  %v691_v58 = vmov 2475754826  }
  0x12   :  { %91 = vperm.xlu0 %571, %v87_v9   ;;  %v405_v11 = vld [vmem:[%s822_s0] sm:$0xff]  ;;  %v76_v16 = vld [vmem:[#allocation6 + $0x28] sm:$0xff]  ;;  %v75_v17 = vld [vmem:[#allocation6 + $0x20] sm:$0xff]  ;;  %v692_v61 = vmov 2131351028   ;;  %s696_s0 = smov [#allocation9]  }
  0x13   :  { %98 = vmatpush.msra.mxu0 %v84_v4  ;;  %v77_v15 = vld [vmem:[#allocation6 + $0x30] sm:$0xff]  ;;  %v74_v18 = vld [vmem:[#allocation6 + $0x18] sm:$0xff]  ;;  %v72_v20 = vld [vmem:[#allocation6 + $0x8] sm:$0xff]  ;;  %v693_v0 = vmov 2102212464   ;;  %s540_s2 = sshll.u32 %s696_s0, 4  ;;  %s541_s2 = int_to_ptr.vmem [resolvable:$true] %s540_s2 }
  0x14   :  { %v73_v19 = vld [vmem:[#allocation6 + $0x10] sm:$0xff]  ;;  %v71_v21 = vld [vmem:[#allocation6] sm:$0xff]  ;;  %v295_v22 = vld [vmem:[#allocation6 + $0xf8] sm:$0xff]  ;;  %v694_v4 = vmov 920167782  }
  0x15   :  { %99 = vmatpush.msra.mxu0 %v83_v5  ;;  %v294_v23 = vld [vmem:[#allocation6 + $0xf0] sm:$0xff]  ;;  %298 = vmatpush.msra.mxu1 %v295_v22  ;;  %v293_v24 = vld [vmem:[#allocation6 + $0xe8] sm:$0xff]  ;;  %v292_v25 = vld [vmem:[#allocation6 + $0xe0] sm:$0xff]  ;;  %v695_v7 = vmov 1326507024  }
  0x16   :  { %v291_v26 = vld [vmem:[#allocation6 + $0xd8] sm:$0xff]  ;;  %v572_v27 = vld [vmem:[#allocation8 + $0x6] ss:$0 sm:$0xff]  ;;  %v290_v28 = vld [vmem:[#allocation6 + $0xd0] sm:$0xff] }
  0x17   :  { %100 = vmatpush.msra.mxu0 %v82_v6  ;;  %299 = vmatpush.msra.mxu1 %v294_v23  ;;  %v289_v30 = vld [vmem:[#allocation6 + $0xc8] sm:$0xff]  ;;  %v288_v32 = vld [vmem:[#allocation6 + $0xc0] sm:$0xff]  ;;  %v287_v34 = vld [vmem:[#allocation6 + $0xb8] sm:$0xff] }
  0x18   :  { %v70_v13 = vld [vmem:[#allocation2] sm:$0xff]  ;;  %v573_v33 = vld [vmem:[#allocation8] ss:$0 sm:$0xff]  ;;  %v285_v39 = vld [vmem:[#allocation6 + $0xa8] sm:$0xff] }
  0x19   :  { %101 = vmatpush.msra.mxu0 %v81_v8  ;;  %407 = vst.msk [vmem:[#allocation2] sm:$0xff] %vm406_vm1, %v405_v11  ;;  %300 = vmatpush.msra.mxu1 %v293_v24  ;;  %v286_v37 = vld [vmem:[#allocation6 + $0xb0] sm:$0xff]  ;;  %v284_v41 = vld [vmem:[#allocation6 + $0xa0] sm:$0xff]  ;;  %v283_v43 = vld [vmem:[#allocation6 + $0x98] sm:$0xff] }
  0x1a   :  { %v282_v45 = vld [vmem:[#allocation6 + $0x90] sm:$0xff]  ;;  %v281_v48 = vld [vmem:[#allocation6 + $0x88] sm:$0xff]  ;;  %v280_v49 = vld [vmem:[#allocation6 + $0x80] sm:$0xff] }
  0x1b   :  { %102 = vmatpush.msra.mxu0 %v80_v10  ;;  %301 = vmatpush.msra.mxu1 %v292_v25 }
  0x1d   :  { %103 = vmatpush.msra.mxu0 %v79_v12  ;;  %302 = vmatpush.msra.mxu1 %v291_v26 }
  0x1f   :  { %104 = vmatpush.msra.mxu0 %v78_v14  ;;  %303 = vmatpush.msra.mxu1 %v290_v28 }
  0x21   :  { %105 = vmatpush.msra.mxu0 %v77_v15  ;;  %304 = vmatpush.msra.mxu1 %v289_v30 }
  0x23   :  { %106 = vmatpush.msra.mxu0 %v76_v16  ;;  %305 = vmatpush.msra.mxu1 %v288_v32 }
  0x25   :  { %107 = vmatpush.msra.mxu0 %v75_v17  ;;  %306 = vmatpush.msra.mxu1 %v287_v34 }
  0x27   :  { %108 = vmatpush.msra.mxu0 %v74_v18  ;;  %307 = vmatpush.msra.mxu1 %v286_v37 }
  0x29   :  { %109 = vmatpush.msra.mxu0 %v73_v19  ;;  %308 = vmatpush.msra.mxu1 %v285_v39 }
  0x2b   :  { %110 = vmatpush.msra.mxu0 %v72_v20  ;;  %309 = vmatpush.msra.mxu1 %v284_v41 }
  0x2d   :  { %111 = vmatpush.msra.mxu0 %v71_v21  ;;  %310 = vmatpush.msra.mxu1 %v283_v43 }
  0x2e   :  { %112 = vmatmul.f32.vlgmr.msra.gmra.mxu0 %v70_v13 }
  0x2f   :  { %311 = vmatpush.msra.mxu1 %v282_v45 }
  0x31   :  { %312 = vmatpush.msra.mxu1 %v281_v48 }
  0x33   :  { %313 = vmatpush.msra.mxu1 %v280_v49 }
  0x84   :  { %v92_v29 = vpop.permute.xlu0 %91 }
  0x85   :  { %v95_v31 = vmul.f32 %v572_v27, %v92_v29 }
  0xab   :  { %v113_v35 = vpop.f32.mrf.mxu0 }
  0xac   :  { %v114_v36 = vadd.f32 %v113_v35, %v95_v31 }
  0xae   :  { %v743_v38 = vadd.f32 %v573_v33, %v114_v36 }
  0xb0   :  { %v124_v40 = vand.u32 2139095040, %v743_v38  ;;  %v121_v46 = vand.u32 2147483647, %v743_v38  ;;  %vm123_vm14 = vcmp.lt.s32.totalorder %v743_v38, 0 }
  0xb2   :  { %v125_v42 = vshrl.u32 %v124_v40, 23  ;;  %v128_v51 = vand.u32 8388607, %v121_v46  ;;  %vm122_vm15 = vcmp.le.f32.partialorder %v121_v46, 0.7853982 }
  0xb4   :  { %v553_v44 = vadd.s32 4294967169, %v125_v42  ;;  %v129_v55 = vor.u32 8388608, %v128_v51 }
  0xb6   :  { %v131_v47 = vadd.s32 1, %v553_v44  ;;  %v760_v14 = vshll.u32 %v129_v55, 8 }
  0xb8   :  { %vm132_vm2 = vcmp.gt.s32.totalorder %v131_v47, 0  ;;  %v170_v23 = vand.u32 65535, %v760_v14  ;;  %v171_v24 = vshrl.u32 %v760_v14, 16 }
  0xb9   :  { %v133_v50 = vsel %vm132_vm2, %v131_v47, 0 }
  0xba   :  { %v135_v52 = vand.u32 31, %v133_v50  ;;  %v751_v54 = vshrl.u32 %v133_v50, 5 }
  0xbc   :  { %v749_v53 = vsub.s32 32, %v135_v52  ;;  %v138_v57 = vshll.u32 %v690_v56, %v135_v52  ;;  %v141_v59 = vshll.u32 %v691_v58, %v135_v52  ;;  %v144_v63 = vshll.u32 %v692_v61, %v135_v52 }
  0xbd   :  { %v147_v2 = vshll.u32 %v693_v0, %v135_v52  ;;  %v150_v6 = vshll.u32 %v694_v4, %v135_v52  ;;  %vm153_vm3 = vcmp.lt.s32.totalorder %v751_v54, 1  ;;  %vm156_vm4 = vcmp.lt.s32.totalorder %v751_v54, 4 }
  0xbe   :  { %v139_v60 = vshrl.u32 %v691_v58, %v749_v53  ;;  %v142_v62 = vshrl.u32 %v692_v61, %v749_v53  ;;  %v145_v1 = vshrl.u32 %v693_v0, %v749_v53  ;;  %v148_v5 = vshrl.u32 %v694_v4, %v749_v53 }
  0xbf   :  { %v151_v8 = vshrl.u32 %v695_v7, %v749_v53  ;;  %vm155_vm5 = vcmp.lt.s32.totalorder %v751_v54, 3  ;;  %vm154_vm6 = vcmp.lt.s32.totalorder %v751_v54, 2  ;;  %v137_v51 = vshrl.u32 %v690_v56, %v749_v53 }
  0xc0   :  { %v140_v9 = vor.u32 %v139_v60, %v138_v57  ;;  %v143_v10 = vor.u32 %v142_v62, %v141_v59  ;;  %v146_v11 = vor.u32 %v145_v1, %v144_v63  ;;  %v149_v12 = vor.u32 %v148_v5, %v147_v2 }
  0xc1   :  { %v152_v13 = vor.u32 %v151_v8, %v150_v6 }
  0xc2   :  { %v161_v15 = vsel %vm153_vm3, %v140_v9, %v143_v10  ;;  %v165_v16 = vsel %vm153_vm3, %v143_v10, %v146_v11  ;;  %v162_v17 = vsel %vm156_vm4, %v149_v12, 920167782  ;;  %v158_v48 = vsel %vm156_vm4, %v146_v11, 2102212464 }
  0xc3   :  { %v166_v18 = vsel %vm156_vm4, %v152_v13, 1326507024  ;;  %v163_v19 = vsel %vm155_vm5, %v146_v11, %v162_v17  ;;  %v157_v60 = vsel %vm153_vm3, %v137_v51, %v140_v9  ;;  %v159_v61 = vsel %vm155_vm5, %v143_v10, %v158_v48 }
  0xc4   :  { %v167_v20 = vsel %vm155_vm5, %v149_v12, %v166_v18  ;;  %v164_v21 = vsel %vm154_vm6, %v161_v15, %v163_v19  ;;  %v160_v53 = vsel %vm154_vm6, %v157_v60, %v159_v61  ;;  %v120_v60 = vmax.f32 %v743_v38, 0.0 }
  0xc5   :  { %v168_v22 = vsel %vm154_vm6, %v165_v16, %v167_v20  ;;  %v194_v27 = vand.u32 65535, %v164_v21  ;;  %v195_v28 = vshrl.u32 %v164_v21, 16  ;;  %v214_v5 = vmul.u32 %v760_v14, %v160_v53  ;;  %v379_v53 = vld [vmem:[#allocation6 + $0x160] sm:$0xff] }
  0xc6   :  { %v172_v25 = vand.u32 65535, %v168_v22  ;;  %v173_v26 = vshrl.u32 %v168_v22, 16  ;;  %vm264_vm4 = vweird.f32 %v743_v38 }
  0xc7   :  { %v197_v31 = vmul.u32 %v195_v28, %v170_v23  ;;  %v198_v32 = vmul.u32 %v194_v27, %v171_v24  ;;  %v196_v36 = vmul.u32 %v194_v27, %v170_v23  ;;  %v199_v41 = vmul.u32 %v195_v28, %v171_v24 }
  0xc8   :  { %v175_v29 = vmul.u32 %v173_v26, %v170_v23  ;;  %v176_v30 = vmul.u32 %v172_v25, %v171_v24  ;;  %v174_v33 = vmul.u32 %v172_v25, %v170_v23  ;;  %v177_v35 = vmul.u32 %v173_v26, %v171_v24 }
  0xc9   :  { %v200_v37 = vshll.u32 %v197_v31, 16  ;;  %v202_v43 = vshll.u32 %v198_v32, 16  ;;  %v201_v58 = vshrl.u32 %v197_v31, 16  ;;  %v203_v0 = vshrl.u32 %v198_v32, 16 }
  0xca   :  { %v178_v34 = vshll.u32 %v175_v29, 16  ;;  %v180_v39 = vshll.u32 %v176_v30, 16  ;;  %v179_v52 = vshrl.u32 %v175_v29, 16  ;;  %v181_v62 = vshrl.u32 %v176_v30, 16 }
  0xcb   :  { %vm204_vm8 = vc.u32 %v196_v36, %v200_v37  ;;  %v206_v44 = vadd.s32 %v200_v37, %v196_v36 }
  0xcc   :  { %vm182_vm7 = vc.u32 %v174_v33, %v178_v34  ;;  %v184_v40 = vadd.s32 %v178_v34, %v174_v33  ;;  %v205_v47 = vsel %vm204_vm8, 1, %v689_v3 }
  0xcd   :  { %v183_v42 = vsel %vm182_vm7, 1, %v689_v3  ;;  %v207_v50 = vadd.s32 %v205_v47, %v199_v41  ;;  %vm208_vm10 = vc.u32 %v206_v44, %v202_v43  ;;  %v210_v4 = vadd.s32 %v206_v44, %v202_v43 }
  0xce   :  { %v185_v45 = vadd.s32 %v183_v42, %v177_v35  ;;  %vm186_vm9 = vc.u32 %v184_v40, %v180_v39  ;;  %v209_v57 = vsel %vm208_vm10, 1, %v689_v3 }
  0xcf   :  { %v187_v49 = vsel %vm186_vm9, 1, %v689_v3  ;;  %v211_v59 = vadd.s32 %v209_v57, %v207_v50 }
  0xd0   :  { %v189_v55 = vadd.s32 %v187_v49, %v185_v45  ;;  %v64_v45 = vlaneseq }
  0xd1   :  { %v212_v1 = vadd.s32 %v211_v59, %v201_v58 }
  0xd2   :  { %v190_v63 = vadd.s32 %v189_v55, %v179_v52  ;;  %v802_v51 = vand.u32 127, %v64_v45 }
  0xd3   :  { %v213_v56 = vadd.s32 %v212_v1, %v203_v0  ;;  %v382_v0 = vld [vmem:[#allocation6 + $0x178] sm:$0xff]  ;;  %v381_v1 = vld [vmem:[#allocation6 + $0x170] sm:$0xff] }
  0xd4   :  { %v191_v2 = vadd.s32 %v190_v63, %v181_v62  ;;  %vm119_vm2 = vcmp.lt.s32.totalorder %v802_v51, 32  ;;  %385 = vmatpush.msra.mxu2 %v382_v0  ;;  %v420_v0 = vld [vmem:[#allocation6 + $0x1a0] sm:$0xff]  ;;  %vm362_vm9 = vcmp.lt.s32.totalorder %v802_v51, 48  ;;  %vm408_vm10 = vcmp.lt.s32.totalorder %v802_v51, 16  ;;  %v467_v51 = vld [vmem:[#allocation6 + $0x258] sm:$0xff] }
  0xd5   :  { %v217_v3 = vadd.s32 1, %v213_v56 }
  0xd6   :  { %vm216_vm11 = vc.u32 %v191_v2, %v210_v4  ;;  %v215_v54 = vadd.s32 %v210_v4, %v191_v2  ;;  %386 = vmatpush.msra.mxu2 %v381_v1  ;;  %v380_v2 = vld [vmem:[#allocation6 + $0x168] sm:$0xff]  ;;  %v574_v4 = vld [vmem:[#allocation8 + $0x1] ss:$0 sm:$0xff] }
  0xd7   :  { %v218_v6 = vsel %vm216_vm11, %v217_v3, %v213_v56  ;;  %v378_v56 = vld [vmem:[#allocation6 + $0x158] sm:$0xff] }
  0xd8   :  { %v219_v7 = vadd.s32 %v218_v6, %v214_v5  ;;  %387 = vmatpush.msra.mxu2 %v380_v2  ;;  %v377_v5 = vld [vmem:[#allocation6 + $0x150] sm:$0xff] }
  0xda   :  { %v220_v8 = vadd.s32 536870912, %v219_v7  ;;  %388 = vmatpush.msra.mxu2 %v379_v53 }
  0xdc   :  { %v221_v9 = vshrl.u32 %v220_v8, 30  ;;  %389 = vmatpush.msra.mxu2 %v378_v56  ;;  %v375_v8 = vld [vmem:[#allocation6 + $0x140] sm:$0xff] }
  0xde   :  { %v222_v11 = vshll.u32 %v221_v9, 30  ;;  %v245_v30 = vsub.s32 4, %v221_v9  ;;  %390 = vmatpush.msra.mxu2 %v377_v5 }
  0xe0   :  { %v223_v10 = vsub.s32 %v219_v7, %v222_v11  ;;  %v246_v35 = vsel %vm123_vm14, %v245_v30, %v221_v9  ;;  %v374_v11 = vld [vmem:[#allocation6 + $0x138] sm:$0xff] }
  0xe1   :  { %v248_v39 = vsel %vm122_vm15, 0, %v246_v35  ;;  %v429_v35 = vld [vmem:[#allocation6 + $0x1e8] sm:$0xff] }
  0xe2   :  { %vm224_vm12 = vcmp.lt.s32.totalorder %v223_v10, 0  ;;  %v225_v12 = vsub.s32 0, %v223_v10  ;;  %v265_v44 = vadd.s32 3, %v248_v39  ;;  %v428_v39 = vld [vmem:[#allocation6 + $0x1e0] sm:$0xff] }
  0xe4   :  { %v226_v13 = vsel %vm224_vm12, %v225_v12, %v223_v10  ;;  %v266_v50 = vand.u32 3, %v265_v44  ;;  %v373_v12 = vld [vmem:[#allocation6 + $0x130] sm:$0xff] }
  0xe5   :  { %v227_v15 = vclz %v226_v13 }
  0xe6   :  { %vm268_vm0 = vcmp.eq.s32.totalorder %v266_v50, 0  ;;  %vm271_vm1 = vcmp.eq.s32.totalorder %v266_v50, 2  ;;  %vm267_vm3 = vcmp.lt.s32.totalorder %v266_v50, 2 }
  0xe7   :  { %v554_v16 = vadd.s32 4294967294, %v227_v15 }
  0xe9   :  { %vm555_vm13 = vcmp.lt.s32.totalorder %v554_v16, 0 }
  0xea   :  { %v230_v17 = vsel %vm555_vm13, 0, %v554_v16  ;;  %v372_v16 = vld [vmem:[#allocation6 + $0x128] sm:$0xff] }
  0xeb   :  { %v231_v18 = vsub.s32 32, %v230_v17  ;;  %v235_v19 = vsub.s32 4294967266, %v230_v17  ;;  %v232_v20 = vshll.u32 %v223_v10, %v230_v17 }
  0xed   :  { %v233_v21 = vshrl.u32 %v215_v54, %v231_v18  ;;  %v236_v22 = vadd.s32 127, %v235_v19  ;;  %v371_v18 = vld [vmem:[#allocation6 + $0x120] sm:$0xff] }
  0xef   :  { %v234_v14 = vor.u32 %v233_v21, %v232_v20  ;;  %v237_v23 = vshll.u32 %v236_v22, 23  ;;  %v370_v21 = vld [vmem:[#allocation6 + $0x118] sm:$0xff] }
  0xf1   :  { %v238_v24 = vor.u32 4788187, %v237_v23  ;;  %v241_v26 = vcvt.s32.f32 %v234_v14  ;;  %v369_v23 = vld [vmem:[#allocation6 + $0x110] sm:$0xff] }
  0xf3   :  { %v239_v25 = vand.u32 2147483647, %v238_v24 }
  0xf5   :  { %v242_v27 = vmul.f32 %v241_v26, %v239_v25  ;;  %v368_v25 = vld [vmem:[#allocation6 + $0x108] sm:$0xff] }
  0xf7   :  { %v243_v28 = vxor.u32 2147483648, %v242_v27 }
  0xf9   :  { %v244_v29 = vsel %vm123_vm14, %v243_v28, %v242_v27  ;;  %v367_v28 = vld [vmem:[#allocation6 + $0x100] sm:$0xff] }
  0xfa   :  { %v247_v31 = vsel %vm122_vm15, %v743_v38, %v244_v29  ;;  %v376_v38 = vld [vmem:[#allocation6 + $0x148] sm:$0xff] }
  0xfb   :  { %v249_v32 = vmul.f32 %v247_v31, %v247_v31  ;;  %391 = vmatpush.msra.mxu2 %v376_v38  ;;  %v409_v38 = vld [vmem:[#allocation2] sm:$0xff] }
  0xfd   :  { %v250_v33 = vmul.f32 -0.001358992, %v249_v32  ;;  %v257_v34 = vmul.f32 -0.00019511016, %v249_v32  ;;  %392 = vmatpush.msra.mxu2 %v375_v8 }
  0xff   :  { %v251_v36 = vadd.f32 0.041655596, %v250_v33  ;;  %v258_v37 = vadd.f32 0.008332121, %v257_v34  ;;  %393 = vmatpush.msra.mxu2 %v374_v11  ;;  %v430_v33 = vld [vmem:[#allocation6 + $0x1f0] sm:$0xff] }
 0x100   :  { %v418_v11 = vld [vmem:[#allocation6 + $0x190] sm:$0xff] }
 0x101   :  { %v252_v40 = vmul.f32 %v251_v36, %v249_v32  ;;  %v259_v41 = vmul.f32 %v258_v37, %v249_v32  ;;  %394 = vmatpush.msra.mxu2 %v373_v12  ;;  %v416_v12 = vld [vmem:[#allocation6 + $0x180] sm:$0xff] }
 0x103   :  { %v253_v42 = vadd.f32 -0.4999988, %v252_v40  ;;  %v260_v43 = vadd.f32 -0.16666654, %v259_v41  ;;  %395 = vmatpush.msra.mxu2 %v372_v16  ;;  %v427_v40 = vld [vmem:[#allocation6 + $0x1d8] sm:$0xff]  ;;  %v469_v16 = vld [vmem:[#allocation6 + $0x268] sm:$0xff] }
 0x105   :  { %v254_v47 = vmul.f32 %v253_v42, %v249_v32  ;;  %v261_v48 = vmul.f32 %v260_v43, %v249_v32  ;;  %396 = vmatpush.msra.mxu2 %v371_v18  ;;  %v431_v32 = vld [vmem:[#allocation6 + $0x1f8] sm:$0xff]  ;;  %v426_v42 = vld [vmem:[#allocation6 + $0x1d0] sm:$0xff]  ;;  %v425_v43 = vld [vmem:[#allocation6 + $0x1c8] sm:$0xff] }
 0x106   :  { %434 = vmatpush.msra.mxu3 %v431_v32  ;;  %v464_v18 = vld [vmem:[#allocation6 + $0x240] sm:$0xff]  ;;  %v509_v32 = vld [vmem:[#allocation6 + $0x2e8] sm:$0xff] }
 0x107   :  { %v255_v46 = vadd.f32 1.0, %v254_v47  ;;  %v262_v49 = vadd.f32 1.0, %v261_v48  ;;  %397 = vmatpush.msra.mxu2 %v370_v21  ;;  %v424_v48 = vld [vmem:[#allocation6 + $0x1c0] sm:$0xff]  ;;  %v461_v21 = vld [vmem:[#allocation6 + $0x228] sm:$0xff] }
 0x108   :  { %435 = vmatpush.msra.mxu3 %v430_v33  ;;  %v508_v33 = vld [vmem:[#allocation6 + $0x2e0] sm:$0xff] }
 0x109   :  { %v263_v52 = vmul.f32 %v262_v49, %v247_v31  ;;  %v272_v55 = vxor.u32 2147483648, %v255_v46  ;;  %398 = vmatpush.msra.mxu2 %v369_v23  ;;  %v423_v49 = vld [vmem:[#allocation6 + $0x1b8] sm:$0xff]  ;;  %v575_v23 = vld [vmem:[#allocation8 + $0x2] ss:$0 sm:$0xff] }
 0x10a   :  { %436 = vmatpush.msra.mxu3 %v429_v35  ;;  %v506_v35 = vld [vmem:[#allocation6 + $0x2d0] sm:$0xff] }
 0x10b   :  { %v269_v57 = vxor.u32 2147483648, %v263_v52  ;;  %v273_v59 = vsel %vm271_vm1, %v272_v55, %v263_v52  ;;  %399 = vmatpush.msra.mxu2 %v368_v25 }
 0x10c   :  { %437 = vmatpush.msra.mxu3 %v428_v39  ;;  %v503_v39 = vld [vmem:[#allocation6 + $0x2b8] sm:$0xff] }
 0x10d   :  { %v270_v58 = vsel %vm268_vm0, %v255_v46, %v269_v57  ;;  %400 = vmatpush.msra.mxu2 %v367_v28  ;;  %v457_v28 = vld [vmem:[#allocation6 + $0x208] sm:$0xff] }
 0x10e   :  { %v274_v61 = vsel %vm267_vm3, %v270_v58, %v273_v59  ;;  %438 = vmatpush.msra.mxu3 %v427_v40  ;;  %v422_v58 = vld [vmem:[#allocation6 + $0x1b0] sm:$0xff] }
 0x10f   :  { %v275_v62 = vsel %vm264_vm4, nan, %v274_v61  ;;  %v502_v40 = vld [vmem:[#allocation6 + $0x2b0] sm:$0xff] }
 0x110   :  { %v278_v63 = vsel %vm119_vm2, %v120_v60, %v275_v62  ;;  %439 = vmatpush.msra.mxu3 %v426_v42  ;;  %v421_v60 = vld [vmem:[#allocation6 + $0x1a8] sm:$0xff]  ;;  %v500_v42 = vld [vmem:[#allocation6 + $0x2a0] sm:$0xff] }
 0x111   :  { %314 = vmatmul.f32.vlgmr.msra.gmra.mxu1 %v278_v63 }
 0x112   :  { %440 = vmatpush.msra.mxu3 %v425_v43  ;;  %v499_v43 = vld [vmem:[#allocation6 + $0x298] sm:$0xff] }
 0x114   :  { %441 = vmatpush.msra.mxu3 %v424_v48 }
 0x116   :  { %442 = vmatpush.msra.mxu3 %v423_v49  ;;  %v497_v49 = vld [vmem:[#allocation6 + $0x288] sm:$0xff] }
 0x118   :  { %443 = vmatpush.msra.mxu3 %v422_v58 }
 0x11a   :  { %444 = vmatpush.msra.mxu3 %v421_v60 }
 0x11c   :  { %445 = vmatpush.msra.mxu3 %v420_v0 }
 0x18e   :  { %v315_v3 = vpop.f32.mrf.mxu1 }
 0x18f   :  { %v807_v6 = vadd.f32 %v574_v4, %v315_v3  ;;  %v419_v4 = vld [vmem:[#allocation6 + $0x198] sm:$0xff] }
 0x190   :  { %446 = vmatpush.msra.mxu3 %v419_v4 }
 0x191   :  { %v810_v7 = vmul.f32 0.70710677, %v807_v6  ;;  %v318_v56 = vmul.f32 0.5, %v807_v6 }
 0x192   :  { %447 = vmatpush.msra.mxu3 %v418_v11 }
 0x193   :  { %v320_v9 = vmul.f32 %v810_v7, %v810_v7 }
 0x195   :  { %v321_v10 = vmin.f32 %v320_v9, 16.0 }
 0x197   :  { %v322_v13 = vmul.f32 2.1237322e-06, %v321_v10  ;;  %v333_v15 = vmul.f32 3.8918573e-05, %v321_v10 }
 0x199   :  { %v323_v17 = vadd.f32 0.00028619796, %v322_v13  ;;  %v334_v54 = vadd.f32 0.001143296, %v333_v15  ;;  %v471_v13 = vld [vmem:[#allocation6 + $0x278] sm:$0xff]  ;;  %v470_v15 = vld [vmem:[#allocation6 + $0x270] sm:$0xff] }
 0x19a   :  { %474 = vmatpush.msrb.mxu0 %v471_v13 }
 0x19b   :  { %v324_v19 = vmul.f32 %v323_v17, %v321_v10  ;;  %v335_v20 = vmul.f32 %v334_v54, %v321_v10  ;;  %v468_v17 = vld [vmem:[#allocation6 + $0x260] sm:$0xff]  ;;  %v466_v54 = vld [vmem:[#allocation6 + $0x250] sm:$0xff] }
 0x19c   :  { %475 = vmatpush.msrb.mxu0 %v470_v15 }
 0x19d   :  { %v336_v22 = vadd.f32 0.014752088, %v335_v20  ;;  %v325_v14 = vadd.f32 0.0036580483, %v324_v19  ;;  %v463_v19 = vld [vmem:[#allocation6 + $0x238] sm:$0xff]  ;;  %v462_v20 = vld [vmem:[#allocation6 + $0x230] sm:$0xff] }
 0x19e   :  { %476 = vmatpush.msrb.mxu0 %v469_v16 }
 0x19f   :  { %v337_v24 = vmul.f32 %v336_v22, %v321_v10  ;;  %v326_v27 = vmul.f32 %v325_v14, %v321_v10  ;;  %v460_v22 = vld [vmem:[#allocation6 + $0x220] sm:$0xff]  ;;  %v459_v14 = vld [vmem:[#allocation6 + $0x218] sm:$0xff] }
 0x1a0   :  { %477 = vmatpush.msrb.mxu0 %v468_v17 }
 0x1a1   :  { %v338_v26 = vadd.f32 0.112945676, %v337_v24  ;;  %v327_v31 = vadd.f32 0.05243302, %v326_v27  ;;  %v458_v27 = vld [vmem:[#allocation6 + $0x210] sm:$0xff] }
 0x1a2   :  { %478 = vmatpush.msrb.mxu0 %v467_v51 }
 0x1a3   :  { %v339_v29 = vmul.f32 %v338_v26, %v321_v10  ;;  %v328_v37 = vmul.f32 %v327_v31, %v321_v10  ;;  %v510_v31 = vld [vmem:[#allocation6 + $0x2f0] sm:$0xff] }
 0x1a4   :  { %479 = vmatpush.msrb.mxu0 %v466_v54 }
 0x1a5   :  { %v340_v30 = vadd.f32 0.4994258, %v339_v29  ;;  %v329_v41 = vadd.f32 0.18741608, %v328_v37  ;;  %v456_v29 = vld [vmem:[#allocation6 + $0x200] sm:$0xff] }
 0x1a6   :  { %v504_v37 = vld [vmem:[#allocation6 + $0x2c0] sm:$0xff] }
 0x1a7   :  { %v341_v34 = vmul.f32 %v340_v30, %v321_v10  ;;  %v330_v45 = vmul.f32 %v329_v41, %v321_v10  ;;  %v417_v10 = vld [vmem:[#allocation6 + $0x188] sm:$0xff]  ;;  %v511_v30 = vld [vmem:[#allocation6 + $0x2f8] sm:$0xff] }
 0x1a8   :  { %448 = vmatpush.msra.mxu3 %v417_v10  ;;  %514 = vmatpush.msrb.mxu1 %v511_v30  ;;  %v501_v41 = vld [vmem:[#allocation6 + $0x2a8] sm:$0xff] }
 0x1a9   :  { %v342_v36 = vadd.f32 1.0, %v341_v34  ;;  %v331_v52 = vadd.f32 1.1283791, %v330_v45  ;;  %v507_v34 = vld [vmem:[#allocation6 + $0x2d8] sm:$0xff] }
 0x1aa   :  { %449 = vmatpush.msra.mxu3 %v416_v12  ;;  %515 = vmatpush.msrb.mxu1 %v510_v31 }
 0x1ab   :  { %579 = vrcp.f32 %v342_v36  ;;  %v354_v50 = vand.u32 2147483648, %v342_v36  ;;  %v352_v57 = vand.u32 2147483647, %v342_v36  ;;  %vm348_vm6 = vweird.f32 %v342_v36 }
 0x1ac   :  { %v332_v62 = vmul.f32 %v331_v52, %v810_v7  ;;  %516 = vmatpush.msrb.mxu1 %v509_v32  ;;  %v577_v52 = vld [vmem:[#allocation8 + $0x4] ss:$0 sm:$0xff] }
 0x1ad   :  { %v355_v61 = vor.u32 1.1754944e-38, %v354_v50  ;;  %vm353_vm8 = vcmp.eq.f32.partialorder %v352_v57, 8.507059e+37  ;;  %v496_v50 = vld [vmem:[#allocation6 + $0x280] sm:$0xff] }
 0x1ae   :  { %517 = vmatpush.msrb.mxu1 %v508_v33 }
 0x1b0   :  { %518 = vmatpush.msrb.mxu1 %v507_v34 }
 0x1b1   :  { %v580_v44 = vpop.eup %579 }
 0x1b2   :  { %v344_v47 = vmul.f32 %v580_v44, %v342_v36  ;;  %vm349_vm5 = vweird.f32 %v580_v44  ;;  %v505_v36 = vld [vmem:[#allocation6 + $0x2c8] sm:$0xff]  ;;  %519 = vmatpush.msrb.mxu1 %v506_v35 }
 0x1b3   :  { %vm350_vm7 = vmor %vm348_vm6, %vm349_vm5 }
 0x1b4   :  { %v345_v46 = vsub.f32 1.0, %v344_v47  ;;  %520 = vmatpush.msrb.mxu1 %v505_v36 }
 0x1b6   :  { %v346_v55 = vmul.f32 %v580_v44, %v345_v46  ;;  %521 = vmatpush.msrb.mxu1 %v504_v37  ;;  %v498_v46 = vld [vmem:[#allocation6 + $0x290] sm:$0xff] }
 0x1b8   :  { %v347_v59 = vadd.f32 %v580_v44, %v346_v55  ;;  %522 = vmatpush.msrb.mxu1 %v503_v39 }
 0x1ba   :  { %v351_v63 = vsel %vm350_vm7, %v580_v44, %v347_v59  ;;  %523 = vmatpush.msrb.mxu1 %v502_v40  ;;  %v576_v44 = vld [vmem:[#allocation8 + $0x3] ss:$0 sm:$0xff]  ;;  %v578_v59 = vld [vmem:[#allocation8 + $0x5] ss:$0 sm:$0xff] }
 0x1bb   :  { %v356_v1 = vsel %vm353_vm8, %v355_v61, %v351_v63 }
 0x1bc   :  { %v357_v2 = vmul.f32 %v356_v1, %v332_v62  ;;  %524 = vmatpush.msrb.mxu1 %v501_v41 }
 0x1be   :  { %v556_v53 = vclamps-f32 %v357_v2, 1.0  ;;  %525 = vmatpush.msrb.mxu1 %v500_v42 }
 0x1c0   :  { %v360_v3 = vadd.f32 1.0, %v556_v53  ;;  %526 = vmatpush.msrb.mxu1 %v499_v43 }
 0x1c2   :  { %v361_v5 = vmul.f32 %v360_v3, %v318_v56  ;;  %527 = vmatpush.msrb.mxu1 %v498_v46 }
 0x1c4   :  { %v365_v7 = vsel %vm362_vm9, %v807_v6, %v361_v5  ;;  %v465_v6 = vld [vmem:[#allocation6 + $0x248] sm:$0xff]  ;;  %528 = vmatpush.msrb.mxu1 %v497_v49 }
 0x1c5   :  { %401 = vmatmul.f32.vlgmr.msra.gmra.mxu2 %v365_v7  ;;  %v412_v8 = vsel %vm408_vm10, %v409_v38, %v365_v7  ;;  %480 = vmatpush.msrb.mxu0 %v465_v6 }
 0x1c6   :  { %v413_v9 = vsel %vm362_vm9, %v412_v8, 0.0  ;;  %529 = vmatpush.msrb.mxu1 %v496_v50 }
 0x1c7   :  { %481 = vmatpush.msrb.mxu0 %v464_v18 }
 0x1c9   :  { %482 = vmatpush.msrb.mxu0 %v463_v19 }
 0x1cb   :  { %483 = vmatpush.msrb.mxu0 %v462_v20 }
 0x1cd   :  { %484 = vmatpush.msrb.mxu0 %v461_v21 }
 0x1cf   :  { %485 = vmatpush.msrb.mxu0 %v460_v22 }
 0x1d1   :  { %486 = vmatpush.msrb.mxu0 %v459_v14 }
 0x1d3   :  { %487 = vmatpush.msrb.mxu0 %v458_v27 }
 0x1d5   :  { %488 = vmatpush.msrb.mxu0 %v457_v28 }
 0x1d7   :  { %489 = vmatpush.msrb.mxu0 %v456_v29 }
 0x248   :  { %v402_v24 = vpop.f32.mrf.mxu2 }
 0x249   :  { %v403_v25 = vadd.f32 %v575_v23, %v402_v24 }
 0x24b   :  { %v414_v26 = vadd.f32 %v413_v9, %v403_v25 }
 0x24d   :  { %450 = vmatmul.f32.vlgmr.msra.gmra.mxu3 %v414_v26 }
 0x2d0   :  { %v451_v45 = vpop.f32.mrf.mxu3 }
 0x2d1   :  { %v452_v47 = vadd.f32 %v576_v44, %v451_v45 }
 0x2d3   :  { %v454_v48 = vmax.f32 %v452_v47, 0.0 }
 0x2d5   :  { %490 = vmatmul.f32.vlgmr.msrb.gmra.mxu0 %v454_v48 }
 0x352   :  { %v491_v55 = vpop.f32.mrf.mxu0 }
 0x353   :  { %v492_v57 = vadd.f32 %v577_v52, %v491_v55 }
 0x355   :  { %v494_v58 = vmax.f32 %v492_v57, 0.0 }
 0x357   :  { %530 = vmatmul.f32.vlgmr.msrb.gmra.mxu1 %v494_v58 }
 0x3d4   :  { %v531_v60 = vpop.f32.mrf.mxu1 }
 0x3d5   :  { %v532_v61 = vadd.f32 %v578_v59, %v531_v60 }
 0x3d7   :  { %534 = vst [vmem:[#allocation9] sm:$0xff] %v532_v61 }
 0x3d8   :  { %545 = dma.vmem_to_hbm [thread:$0]  %s541_s2, 128, %s543_s13, [#allocation5]  }
 0x3d9   :  { %681 = dma.done.wait [#allocation5], 128  }
 0x3da   :  { %682 = vsyncadd [#allocation5], 4294967168 }
 0x3db   :  { %550 = vsyncpa [#allocation4], 1 }
 0x3dc   :  { %551 = vsyncpa [#allocation7], 1 }
 0x3dd   :  { %552 = vsyncpa [#allocation5], 1 }

</bundles_post_ra>
